<compile_context>
chip_gen: v7x
topology: tpu7x:2x2x1
jax: 0.10.0
libtpu: 0.0.40
codegen_flags: <defaults>
</compile_context>

<pallas_src>
import jax
import jax.numpy as jnp
from jax.experimental import pallas as pl
from jax.experimental.pallas import tpu as pltpu


def generator_kernel(x_ref, w1_ref, b1_ref, w2_ref, b2_ref, o_ref):
    # First linear (bf16 x bf16 -> f32 accumulate on the MXU) + LeakyReLU(0.01).
    x = x_ref[...].astype(jnp.bfloat16)
    h = jnp.dot(x, w1_ref[...], preferred_element_type=jnp.float32)
    h = h + b1_ref[...]                       # (tb, 256) + (1, 256), f32
    h = jnp.maximum(h, 0.01 * h)              # LeakyReLU -> single vmax per vreg

    # Second linear + Tanh (bias add and tanh kept in f32; EUP handles tanh).
    y = jnp.dot(h.astype(jnp.bfloat16), w2_ref[...],
                preferred_element_type=jnp.float32)
    y = y + b2_ref[...]                       # (tb, 896) + (1, 896), f32
    o_ref[...] = jnp.tanh(y).astype(o_ref.dtype)


def generator_forward(x, w1, b1, w2, b2, *, img_dim, tile_b=32):
    """x: (B, z_dim) f32. w1/w2: bf16 (in, out) with out of w2 padded to 128-multiple.
    b1/b2: f32 (1, out). Returns (B, img_dim) f32."""
    B, z_dim = x.shape
    hidden = w1.shape[1]
    img_pad = w2.shape[1]

    # Pad batch up to a multiple of the batch tile (sublane-aligned tile).
    B_pad = ((B + tile_b - 1) // tile_b) * tile_b
    if B_pad != B:
        x = jnp.pad(x, ((0, B_pad - B), (0, 0)))
    grid = (B_pad // tile_b,)

    # Advisory cost hint so XLA can overlap this small call with its neighbors.
    flops = 2 * B_pad * (z_dim * hidden + hidden * img_pad)
    transcendentals = B_pad * img_pad  # tanh
    bytes_accessed = (int(x.size) * 4            # x stream (f32)
                      + int(w1.size) * 2 + int(w2.size) * 2   # bf16 weights, loaded once
                      + int(b1.size) * 4 + int(b2.size) * 4   # f32 biases
                      + B_pad * img_pad * 4)     # f32 output stream

    out = pl.pallas_call(
        generator_kernel,
        out_shape=jax.ShapeDtypeStruct((B_pad, img_pad), jnp.float32),
        grid=grid,
        in_specs=[
            # Batch tiles of x stream through VMEM...
            pl.BlockSpec((tile_b, z_dim), lambda i: (i, 0)),
            # ...while weights/biases map to the same block every step -> loaded once,
            # VMEM-resident for the whole grid.
            pl.BlockSpec((z_dim, hidden), lambda i: (0, 0)),
            pl.BlockSpec((1, hidden), lambda i: (0, 0)),
            pl.BlockSpec((hidden, img_pad), lambda i: (0, 0)),
            pl.BlockSpec((1, img_pad), lambda i: (0, 0)),
        ],
        out_specs=pl.BlockSpec((tile_b, img_pad), lambda i: (i, 0)),
        compiler_params=pltpu.CompilerParams(
            dimension_semantics=("parallel",)),
        cost_estimate=pl.CostEstimate(
            flops=flops,
            transcendentals=transcendentals,
            bytes_accessed=bytes_accessed),
    )(x, w1, b1, w2, b2)

    # Slice off batch padding and the lane padding (896 -> img_dim).
    return out[:B, :img_dim]


def round_up(n, m):
    return ((n + m - 1) // m) * m


def init_generator_params(key, z_dim, hidden, img_dim):
    """PyTorch nn.Linear-style init (U(-1/sqrt(in), 1/sqrt(in))), then:
       - weights cast to bf16 (halve weight HBM traffic; MXU-native),
       - second-layer out dim zero-padded to a multiple of 128 (lane-dense output)."""
    k1, k2, k3, k4 = jax.random.split(key, 4)
    bound1 = 1.0 / (z_dim ** 0.5)
    bound2 = 1.0 / (hidden ** 0.5)
    img_pad = round_up(img_dim, 128)

    w1 = jax.random.uniform(k1, (z_dim, hidden), jnp.float32, -bound1, bound1)
    b1 = jax.random.uniform(k2, (1, hidden), jnp.float32, -bound1, bound1)
    w2 = jax.random.uniform(k3, (hidden, img_dim), jnp.float32, -bound2, bound2)
    b2 = jax.random.uniform(k4, (1, img_dim), jnp.float32, -bound2, bound2)

    w2_pad = jnp.pad(w2, ((0, 0), (0, img_pad - img_dim)))
    b2_pad = jnp.pad(b2, ((0, 0), (0, img_pad - img_dim)))

    return (w1.astype(jnp.bfloat16), b1,
            w2_pad.astype(jnp.bfloat16), b2_pad)


def generator_reference_bf16(x, w1, b1, w2, b2, img_dim):
    """Same numerics as the kernel (bf16 weights/activations into MXU, f32 accumulate)."""
    h = jnp.dot(x.astype(jnp.bfloat16), w1, preferred_element_type=jnp.float32) + b1
    h = jnp.maximum(h, 0.01 * h)
    y = jnp.dot(h.astype(jnp.bfloat16), w2, preferred_element_type=jnp.float32) + b2
    return jnp.tanh(y)[:, :img_dim]


def generator_reference_f32(x, w1, b1, w2, b2, img_dim):
    """Full-f32 reference matching the original PyTorch module semantics."""
    h = x @ w1.astype(jnp.float32) + b1
    h = jnp.where(h > 0, h, 0.01 * h)
    y = h @ w2.astype(jnp.float32) + b2
    return jnp.tanh(y)[:, :img_dim]


if __name__ == "__main__":
    z_dim = 64
    hidden = 256
    img_dim = 784   # 28*28 MNIST-style generator output
    batch = 64      # small but enough to exercise the batched grid (2 tiles of 32)

    key = jax.random.PRNGKey(0)
    kx, kp = jax.random.split(key)
    x = jax.random.normal(kx, (batch, z_dim), jnp.float32)
    w1, b1, w2, b2 = init_generator_params(kp, z_dim, hidden, img_dim)

    out = generator_forward(x, w1, b1, w2, b2, img_dim=img_dim, tile_b=32)
    out = jax.block_until_ready(out)
    assert out.shape == (batch, img_dim)

    # Tight check against a JAX reference with identical bf16/f32-accum numerics.
    ref_bf16 = generator_reference_bf16(x, w1, b1, w2, b2, img_dim)
    assert jnp.allclose(out, ref_bf16, atol=2e-3, rtol=2e-3), \
        "mismatch vs bf16-weight JAX reference"

    # Loose sanity check against the original f32 PyTorch-style semantics.
    ref_f32 = generator_reference_f32(x, w1, b1, w2, b2, img_dim)
    assert jnp.allclose(out, ref_f32, atol=5e-2, rtol=5e-2), \
        "drift vs f32 reference larger than expected for bf16 weights"

    print("KERNEL_OK")
</pallas_src>

<mosaic_0001>
module attributes {stable_mosaic.version = 11 : i64} {
  func.func @generator_kernel(%arg0: i32, %arg1: memref<32x64xf32, #tpu.memory_space<vmem>>, %arg2: memref<64x256xbf16, #tpu.memory_space<vmem>>, %arg3: memref<1x256xf32, #tpu.memory_space<vmem>>, %arg4: memref<256x896xbf16, #tpu.memory_space<vmem>>, %arg5: memref<1x896xf32, #tpu.memory_space<vmem>>, %arg6: memref<32x896xf32, #tpu.memory_space<vmem>>) attributes {dimension_semantics = [#tpu.dimension_semantics<parallel>], iteration_bounds = array<i64: 2>, scalar_prefetch = 0 : i64, scratch_operands = 0 : i64, tpu.core_type = #tpu.core_type<tc>, window_params = [{transform_indices = @transform_0, window_bounds = array<i64: 32, 64>}, {pipeline_mode = #tpu.pipeline_mode<synchronous>, transform_indices = @transform_1, window_bounds = array<i64: 64, 256>}, {pipeline_mode = #tpu.pipeline_mode<synchronous>, transform_indices = @transform_2, window_bounds = array<i64: 1, 256>}, {pipeline_mode = #tpu.pipeline_mode<synchronous>, transform_indices = @transform_3, window_bounds = array<i64: 256, 896>}, {pipeline_mode = #tpu.pipeline_mode<synchronous>, transform_indices = @transform_4, window_bounds = array<i64: 1, 896>}, {transform_indices = @transform_5, window_bounds = array<i64: 32, 896>}]} {
    %c0 = arith.constant 0 : index
    %c0_0 = arith.constant 0 : index
    %0 = vector.load %arg1[%c0, %c0_0] : memref<32x64xf32, #tpu.memory_space<vmem>>, vector<32x64xf32>
    %1 = arith.truncf %0 : vector<32x64xf32> to vector<32x64xbf16>
    %c0_1 = arith.constant 0 : index
    %c0_2 = arith.constant 0 : index
    %2 = vector.load %arg2[%c0_1, %c0_2] : memref<64x256xbf16, #tpu.memory_space<vmem>>, vector<64x256xbf16>
    %cst = arith.constant dense<0.000000e+00> : vector<32x256xf32>
    %3 = tpu.matmul %1, %2, %cst {dimension_numbers = #tpu.dot_dimension_numbers<[1], [0], [0], [1], [0, 0, 1, 1], [], []>} : vector<32x64xbf16>, vector<64x256xbf16>, vector<32x256xf32> -> vector<32x256xf32>
    %c0_3 = arith.constant 0 : index
    %c0_4 = arith.constant 0 : index
    %4 = vector.load %arg3[%c0_3, %c0_4] : memref<1x256xf32, #tpu.memory_space<vmem>>, vector<1x256xf32>
    %5 = vector.broadcast %4 : vector<1x256xf32> to vector<32x256xf32>
    %6 = arith.addf %3, %5 : vector<32x256xf32>
    %cst_5 = arith.constant 0.00999999977 : f32
    %7 = vector.broadcast %cst_5 : f32 to vector<32x256xf32>
    %8 = arith.mulf %7, %6 : vector<32x256xf32>
    %9 = arith.maximumf %6, %8 : vector<32x256xf32>
    %10 = arith.truncf %9 : vector<32x256xf32> to vector<32x256xbf16>
    %c0_6 = arith.constant 0 : index
    %c0_7 = arith.constant 0 : index
    %11 = vector.load %arg4[%c0_6, %c0_7] : memref<256x896xbf16, #tpu.memory_space<vmem>>, vector<256x896xbf16>
    %cst_8 = arith.constant dense<0.000000e+00> : vector<32x896xf32>
    %12 = tpu.matmul %10, %11, %cst_8 {dimension_numbers = #tpu.dot_dimension_numbers<[1], [0], [0], [1], [0, 0, 1, 1], [], []>} : vector<32x256xbf16>, vector<256x896xbf16>, vector<32x896xf32> -> vector<32x896xf32>
    %c0_9 = arith.constant 0 : index
    %c0_10 = arith.constant 0 : index
    %13 = vector.load %arg5[%c0_9, %c0_10] : memref<1x896xf32, #tpu.memory_space<vmem>>, vector<1x896xf32>
    %14 = vector.broadcast %13 : vector<1x896xf32> to vector<32x896xf32>
    %15 = arith.addf %12, %14 : vector<32x896xf32>
    %16 = math.tanh %15 : vector<32x896xf32>
    %c0_11 = arith.constant 0 : index
    %c0_12 = arith.constant 0 : index
    %17 = vector.load %arg6[%c0_11, %c0_12] : memref<32x896xf32, #tpu.memory_space<vmem>>, vector<32x896xf32>
    tpu.vector_store %arg6[%c0_11, %c0_12], %16 {strides = array<i32>} : memref<32x896xf32, #tpu.memory_space<vmem>>, vector<32x896xf32>,
    return
  }
  func.func @transform_0(%arg0: i32) -> (i32, i32) {
    %c0_i32 = arith.constant 0 : i32
    %c0_i32_0 = arith.constant 0 : i32
    return %arg0, %c0_i32 : i32, i32
  }
  func.func @transform_1(%arg0: i32) -> (i32, i32) {
    %c0_i32 = arith.constant 0 : i32
    %c0_i32_0 = arith.constant 0 : i32
    %c0_i32_1 = arith.constant 0 : i32
    return %c0_i32, %c0_i32_0 : i32, i32
  }
  func.func @transform_2(%arg0: i32) -> (i32, i32) {
    %c0_i32 = arith.constant 0 : i32
    %c0_i32_0 = arith.constant 0 : i32
    %c0_i32_1 = arith.constant 0 : i32
    return %c0_i32, %c0_i32_0 : i32, i32
  }
  func.func @transform_3(%arg0: i32) -> (i32, i32) {
    %c0_i32 = arith.constant 0 : i32
    %c0_i32_0 = arith.constant 0 : i32
    %c0_i32_1 = arith.constant 0 : i32
    return %c0_i32, %c0_i32_0 : i32, i32
  }
  func.func @transform_4(%arg0: i32) -> (i32, i32) {
    %c0_i32 = arith.constant 0 : i32
    %c0_i32_0 = arith.constant 0 : i32
    %c0_i32_1 = arith.constant 0 : i32
    return %c0_i32, %c0_i32_0 : i32, i32
  }
  func.func @transform_5(%arg0: i32) -> (i32, i32) {
    %c0_i32 = arith.constant 0 : i32
    %c0_i32_0 = arith.constant 0 : i32
    return %arg0, %c0_i32 : i32, i32
  }
}

</mosaic_0001>

<bundles_post_ra>
// kernel: tpu_custom_call.1
= control target key start
LH: loop header
LB: loop body
LE: loop exit
PB: predicated region body
PF: predicated region fallthrough
CT: control target
= control target key end

     0   :  { %10 = vsyncpa [#allocation3], 0  ;;  %s2534_s0 = inlined_call_operand.hbm [shape: f32[64,64], index: 0, kind: input, shape index: {}]   ;;  %s2535_s1 = inlined_call_operand.hbm [shape: bf16[64,256], index: 1, kind: input, shape index: {}]   ;;  %s2536_s2 = inlined_call_operand.vmem [shape: f32[1,256], index: 2, kind: input, shape index: {}]   ;;  %s2537_s3 = inlined_call_operand.hbm [shape: bf16[256,896], index: 3, kind: input, shape index: {}]   ;;  %s2538_s4 = inlined_call_operand.vmem [shape: f32[1,896], index: 4, kind: input, shape index: {}]   ;;  %s2539_s5 = inlined_call_operand.hbm [shape: f32[64,896], index: 5, kind: output, shape index: {}]  }
   0x1   :  { %12 = vsyncpa [#allocation3 + $0x1], 0 }
   0x2   :  { %13 = vsyncpa [#allocation6], 0 }
   0x3   :  { %14 = vsyncpa [#allocation4], 0 }
   0x4   :  { %16 = vsyncpa [#allocation4 + $0x1], 0  ;;  %s2204_s18 = smov 0   ;;  %s2206_s19 = smov 0  }
   0x5   :  { %s2208_s20 = smov 0   ;;  %s2210_s21 = smov 0  }
   0x6 LB: > { %s2225_s22 = sadd.s32 4294967295, %s2161_s21   ;;  %s1533_s23 = sadd.s32 4294967294, %s2161_s21   ;;  %s2161_s21 = sphi %s2210_s21, %s2559_s21   ;;  %s2157_s20 = sphi %s2208_s20, %s2558_s20   ;;  %s2153_s19 = sphi %s2206_s19, %s2557_s19   ;;  %s2149_s18 = sphi %s2204_s18, %s2556_s18  }
   0x7   : > { %p42_p0 = scmp.ne.s32.totalorder %s2153_s19, %s2149_s18  ;;  %p2540_p1 = scmp.eq.s32.totalorder %s2225_s22, 0 }
   0x8   : > { %p156_p3 = scmp.eq.s32.totalorder %s1533_s23, 1  ;;  %p1534_p5 = scmp.ge.s32.totalorder %s2161_s21, 1 }
   0x9   : > { %p2234_p4 = por %p2540_p1, %p42_p0  ;;  %p163_p7 = scmp.lt.s32.totalorder %s2161_s21, 3 }
   0xa   : > { %p2239_p6 = por %p156_p3, %p42_p0  ;;  %s2163_s27 = smov [#allocation5]  }
   0xb   : > { %s2543_s24 = scalar_select %p2234_p4, 1, 0 }
   0xc   : > { %s2544_s25 = scalar_select %p2239_p6, 1, 0 }
   0xd   : > { %p2244_p8 = pnand %p1534_p5, %p163_p7  ;;  %s175_s28 = sshll.u32 %s2163_s27, 4  ;;  %s2248_s28 = int_to_ptr.vmem [resolvable:$true] %s175_s28 }
   0xe   : > { %s2164_s30 = smov [#allocation7]   ;;  %s2005_s9 = scalar_lea.hbm %s2535_s1, 1024 }
   0xf   : > { %p1715_p9 = pneg %p2244_p8  ;;  %s191_s6 = sshll.u32 %s2164_s30, 4  ;;  %s2259_s6 = int_to_ptr.vmem [resolvable:$true] %s191_s6 }
  0x10   : > { %p2006_p12 = scmp.ne.s32.totalorder %s2535_s1, %s2005_s9  ;;  %p2012_p5 = scmp.lt.u32.totalorder %s2005_s9, %s2535_s1 }
  0x11   : > { %p2255_p11 = pnand %p1715_p9, %p2540_p1 }
  0x13   : > { %p2007_p13 = pneg %p2255_p11 }
  0x15   : > { %p2008_p0 = pnand %p2007_p13, %p2006_p12 }
  0x17   : > { %p2009_p3 = pneg %p2008_p0 }
  0x19   : > { %p2014_p7 = pnand %p2012_p5, %p2009_p3 }
  0x1b   : > { %2017 = shalt.err (!%p2014_p7)
}
  0x1c   : > { %s2018_s14 = scalar_lea.vmem %s2248_s28, 1024  ;;  %p2026_p2 = scmp.lt.s32.totalorder %s2248_s28, %s2248_s28 }
  0x1d   : > { %p2019_p9 = scmp.ne.s32.totalorder %s2248_s28, %s2018_s14  ;;  %p2027_p12 = scmp.lt.s32.totalorder %s2018_s14, %s2018_s14 }
  0x1f   : > { %p2021_p10 = pnand %p2019_p9, %p2007_p13  ;;  %p2028_p0 = por %p2027_p12, %p2026_p2 }
  0x21   : > { %p2022_p1 = pneg %p2021_p10 }
  0x23   : > { %p2029_p6 = pnand %p2028_p0, %p2022_p1 }
  0x25   : > { %2032 = shalt.err (!%p2029_p6)
}
  0x26   : > { %s2165_s15 = smov 128   ;;  %s2166_s16 = smov 8  }
  0x27   : > { %1718 = dma.hbm_to_vmem [thread:$0]  (!%p2255_p11), %s2535_s1, 1024, %s2248_s28, [#allocation6], %s2165_s15, %s2165_s15, %s2166_s16  }
  0x28   : > { %s2033_s7 = scalar_lea.hbm %s2537_s3, 14336 }
  0x29   : > { %p2034_p1 = scmp.ne.s32.totalorder %s2537_s3, %s2033_s7  ;;  %p2040_p10 = scmp.lt.u32.totalorder %s2033_s7, %s2537_s3 }
  0x2b   : > { %p2036_p2 = pnand %p2034_p1, %p2007_p13 }
  0x2d   : > { %p2037_p6 = pneg %p2036_p2 }
  0x2f   : > { %p2042_p3 = pnand %p2040_p10, %p2037_p6 }
  0x31   : > { %2045 = shalt.err (!%p2042_p3)
}
  0x32   : > { %s2046_s28 = scalar_lea.vmem %s2259_s6, 14336  ;;  %p2054_p12 = scmp.lt.s32.totalorder %s2259_s6, %s2259_s6 }
  0x33   : > { %p2047_p5 = scmp.ne.s32.totalorder %s2259_s6, %s2046_s28  ;;  %p2055_p0 = scmp.lt.s32.totalorder %s2046_s28, %s2046_s28 }
  0x35   : > { %p2049_p7 = pnand %p2047_p5, %p2007_p13  ;;  %p2056_p1 = por %p2055_p0, %p2054_p12 }
  0x37   : > { %p2050_p9 = pneg %p2049_p7 }
  0x39   : > { %p2057_p2 = pnand %p2056_p1, %p2050_p9 }
  0x3b   : > { %2060 = shalt.err (!%p2057_p2)
}
  0x3c   : > { %s2167_s12 = smov 448   ;;  %s2168_s13 = smov 28  }
  0x3d   : > { %1721 = dma.hbm_to_vmem [thread:$0]  (!%p2255_p11), %s2537_s3, 14336, %s2259_s6, [#allocation6], %s2167_s12, %s2167_s12, %s2168_s13  }
  0x3e   : > { %s2317_s23 = sadd.s32 1, %s2161_s21   ;;  %s29_s30 = sadd.s32 1, %s2157_s20 }
  0x3f   : > { %s26_s27 = ssub.s32 %s2161_s21, %s2317_s23  ;;  %p36_p6 = scmp.ne.s32.totalorder %s2157_s20, %s2153_s19 }
  0x40   : > { %p27_p13 = scmp.eq.s32.totalorder %s26_s27, 0  ;;  %p37_p10 = scmp.eq.s32.totalorder %s2161_s21, 0 }
  0x41   : > { %p2547_p5 = scmp.eq.s32.totalorder %s2225_s22, 1  ;;  %p1732_p9 = scmp.lt.s32.totalorder %s2161_s21, 2 }
  0x42   : > { %s2326_s7 = scalar_select %p27_p13, %s2157_s20, %s29_s30  }
  0x43   : > { %p38_p3 = por %p37_p10, %p36_p6  ;;  %p2330_p7 = por %p2547_p5, %p36_p6 }
  0x44   : > { %s208_s29 = sand.u32 1, %s2157_s20   ;;  %s1672_s6 = sshll.u32 %s2161_s21, 9 }
  0x45   : > { %s2548_s8 = scalar_select %p2330_p7, 1, 0 }
  0x46   : > { %s1538_s9 = sshll.u32 %s208_s29, 5  ;;  %s2340_s28 = scalar_lea.hbm %s2534_s0, %s1672_s6 }
  0x47   : > { %s212_s12 = scalar_lea.vmem [#allocation2], %s1538_s9  ;;  %p2344_p11 = pnand %p1732_p9, %p38_p3 }
  0x48   : > { %s219_s13 = sshll.u32 %s212_s12, 4  ;;  %s2348_s17 = scalar_lea.sflag [#allocation3], %s208_s29  ;;  %s2342_s13 = int_to_ptr.vmem [resolvable:$true] %s219_s13 }
  0x49   : > { %s2061_s27 = scalar_lea.hbm %s2340_s28, 512  ;;  %p2063_p0 = pneg %p2344_p11 }
  0x4a   : > { %p2062_p12 = scmp.ne.s32.totalorder %s2340_s28, %s2061_s27  ;;  %s2066_s6 = scalar_lea.hbm %s2534_s0, 1024 }
  0x4b   : > { %p2067_p13 = scmp.lt.u32.totalorder %s2340_s28, %s2534_s0  ;;  %p2068_p6 = scmp.lt.u32.totalorder %s2066_s6, %s2061_s27 }
  0x4c   : > { %p2064_p1 = pnand %p2063_p0, %p2062_p12  ;;  %p2070_p3 = scmp.lt.u32.totalorder %s2061_s27, %s2340_s28 }
  0x4d   : > { %p2069_p10 = por %p2068_p6, %p2067_p13 }
  0x4e   : > { %p2065_p2 = pneg %p2064_p1 }
  0x4f   : > { %p2071_p5 = por %p2070_p3, %p2069_p10 }
  0x51   : > { %p2072_p9 = pnand %p2071_p5, %p2065_p2 }
  0x53   : > { %2075 = shalt.err (!%p2072_p9)
}
  0x54   : > { %s2076_s29 = scalar_lea.vmem %s2342_s13, 512  ;;  %s2169_s12 = smov [#allocation2]  }
  0x55   : > { %p2077_p12 = scmp.ne.s32.totalorder %s2342_s13, %s2076_s29  ;;  %s2081_s30 = sshll.u32 %s2169_s12, 4  ;;  %s2082_s30 = int_to_ptr.vmem [resolvable:$false] %s2081_s30 }
  0x56   : > { %s2083_s9 = scalar_lea.vmem %s2082_s30, 1024  ;;  %p2084_p4 = scmp.lt.s32.totalorder %s2342_s13, %s2082_s30 }
  0x57   : > { %p2079_p1 = pnand %p2077_p12, %p2063_p0  ;;  %p2085_p13 = scmp.lt.s32.totalorder %s2083_s9, %s2076_s29 }
  0x59   : > { %p2080_p7 = pneg %p2079_p1  ;;  %p2086_p6 = por %p2085_p13, %p2084_p4 }
  0x5b   : > { %p2087_p10 = pnand %p2086_p6, %p2080_p7 }
  0x5d   : > { %2090 = shalt.err (!%p2087_p10)
}
  0x5e   : > { %1725 = dma.hbm_to_vmem [thread:$0]  (!%p2344_p11), %s2340_s28, 512, %s2342_s13, %s2348_s17, %s2165_s15, %s2165_s15, %s2166_s16  }
  0x5f   : > { %231 = sbr.rel (%p2244_p8) target bundleno = 662 (0x296), region = 40  ;;  %s2382_s27 = sand.u32 (!%p2244_p8), 1, %s2153_s19  }
  0x60   : > { %s1542_s6 = sshll.u32 (!%p2244_p8), %s2382_s27, 5  ;;  %s234_s10 = scalar_lea.sflag (!%p2244_p8), [#allocation3], %s2382_s27 }
  0x61   : > { %s2386_s11 = scalar_lea.vmem (!%p2244_p8), [#allocation2], %s1542_s6  ;;  %p2550_p4 = scmp.ne.s32.totalorder (!%p2244_p8), %s2543_s24, 0 }
  0x66   : > { %2136 = dma.done.wait (%p2550_p4), %s234_s10, 512  }
  0x67   : > { %2138 = vsyncadd (%p2550_p4), %s234_s10, 4294966784  ;;  %p2551_p7 = scmp.eq.s32.totalorder %s2225_s22, 0 }
  0x69   : > { %2140 = dma.done.wait (%p2551_p7), [#allocation6], 15360   ;;  %p2552_p8 = pmov %p2551_p7 }
  0x6a   : > { %v2170_v0 = vmov 0   ;;  %v1777_v1 = vld [vmem:[#allocation5 + $0x4] ss:$8 sps:$4 sm:$0xff]   ;;  %v1779_v2 = vld [vmem:[#allocation5] ss:$8 sps:$4 sm:$0xff]   ;;  %vm341_vm0 = vcmask 523264  }
  0x6b   : > { %2142 = vsyncadd (%p2552_p8), [#allocation6], 4294951936  ;;  %380 = vmatprep.mubr.bf16.mxu0 %v2170_v0  ;;  %348 = vmatprep.subr.bf16.mxu0 %v1777_v1  ;;  %v1780_v3 = vld [vmem:[#allocation5 + $0x14] ss:$8 sps:$4 sm:$0xff]   ;;  %v1782_v4 = vld [vmem:[#allocation5 + $0x10] ss:$8 sps:$4 sm:$0xff]  }
  0x6c   : > { %349 = vmatpush1.bf16.msra.mxu0 %v1779_v2  ;;  %v1783_v5 = vld [vmem:[#allocation5 + $0x24] ss:$8 sps:$4 sm:$0xff]   ;;  %v1785_v6 = vld [vmem:[#allocation5 + $0x20] ss:$8 sps:$4 sm:$0xff]   ;;  %v1786_v8 = vld [vmem:[#allocation5 + $0x34] ss:$8 sps:$4 sm:$0xff]  }
  0x6d   : > { %350 = vmatprep.subr.bf16.mxu0 %v1780_v3  ;;  %v1789_v7 = vld [vmem:[#allocation7 + $0x4] ss:$28 sps:$4 sm:$0xff]   ;;  %v1788_v9 = vld [vmem:[#allocation5 + $0x30] ss:$8 sps:$4 sm:$0xff]   ;;  %v276_v13 = vld [vmem:[%s2386_s11 + $0x8] sm:$0xff]  ;;  %s1701_s28 = smul.u32 224, %s2382_s27 }
  0x6e   : > { %v275_v10 = vld [vmem:[%s2386_s11] sm:$0xff]  ;;  %1162 = vmatprep.subr.bf16.mxu1 %v1789_v7  ;;  %v1795_v12 = vld [vmem:[#allocation7 + $0x3c] ss:$28 sps:$4 sm:$0xff]   ;;  %v1793_v14 = vld [vmem:[#allocation7 + $0xc] ss:$28 sps:$4 sm:$0xff]   ;;  %s1702_s14 = smul.u32 3584, %s2225_s22 }
  0x6f   : > { %v1794_v11 = vld [vmem:[#allocation7] ss:$28 sps:$4 sm:$0xff]   ;;  %v1800_v15 = vld [vmem:[#allocation7 + $0x38] ss:$28 sps:$4 sm:$0xff]   ;;  %v279_v17 = vpack.c.bf16 %v276_v13, %v275_v10  ;;  %v1791_v18 = vld [vmem:[#allocation7 + $0x8] ss:$28 sps:$4 sm:$0xff]  }
  0x70   : > { %351 = vmatpush1.bf16.msra.mxu0 %v1782_v4  ;;  %1163 = vmatpush1.bf16.msra.mxu1 %v1794_v11  ;;  %v1801_v16 = vld [vmem:[#allocation7 + $0x74] ss:$28 sps:$4 sm:$0xff]   ;;  %v1799_v19 = vld [vmem:[#allocation7 + $0x44] ss:$28 sps:$4 sm:$0xff]   ;;  %v1807_v21 = vld [vmem:[#allocation7 + $0xac] ss:$28 sps:$4 sm:$0xff]   ;;  %s2485_s30 = scalar_lea.hbm %s2539_s5, %s1702_s14 }
  0x71   : > { %352 = vmatprep.subr.bf16.mxu0 %v1783_v5  ;;  %1164 = vmatprep.subr.bf16.mxu1 %v1795_v12  ;;  %v1806_v20 = vld [vmem:[#allocation7 + $0x70] ss:$28 sps:$4 sm:$0xff]   ;;  %v278_v23 = vld [vmem:[%s2386_s11 + $0x18] sm:$0xff]  ;;  %v1812_v26 = vld [vmem:[#allocation7 + $0xa8] ss:$28 sps:$4 sm:$0xff]   ;;  %s2447_s13 = scalar_lea.vmem [#allocation8], %s1701_s28 }
  0x72   : > { %v277_v22 = vld [vmem:[%s2386_s11 + $0x10] sm:$0xff]  ;;  %v1797_v24 = vld [vmem:[#allocation7 + $0x40] ss:$28 sps:$4 sm:$0xff]   ;;  %v1817_v34 = vld [vmem:[#allocation7 + $0xec] ss:$28 sps:$4 sm:$0xff]   ;;  %s1441_s17 = sshll.u32 %s2447_s13, 4  ;;  %s2488_s17 = int_to_ptr.vmem [resolvable:$true] %s1441_s17 }
  0x73   : > { %v1805_v25 = vld [vmem:[#allocation7 + $0x7c] ss:$28 sps:$4 sm:$0xff]   ;;  %v1813_v27 = vld [vmem:[#allocation7 + $0xe4] ss:$28 sps:$4 sm:$0xff]   ;;  %v280_v28 = vpack.c.bf16 %v278_v23, %v277_v22  ;;  %v1811_v30 = vld [vmem:[#allocation7 + $0xb4] ss:$28 sps:$4 sm:$0xff]  }
  0x74   : > { %353 = vmatpush1.bf16.msra.mxu0 %v1785_v6  ;;  %1165 = vmatpush1.bf16.msra.mxu1 %v1800_v15  ;;  %v1803_v29 = vld [vmem:[#allocation7 + $0x78] ss:$28 sps:$4 sm:$0xff]   ;;  %v1818_v31 = vld [vmem:[#allocation7 + $0xe0] ss:$28 sps:$4 sm:$0xff]   ;;  %v1809_v33 = vld [vmem:[#allocation7 + $0xb0] ss:$28 sps:$4 sm:$0xff]  }
  0x75   : > { %354 = vmatprep.subr.bf16.mxu0 %v1786_v8  ;;  %1166 = vmatprep.subr.bf16.mxu1 %v1801_v16  ;;  %v1819_v32 = vld [vmem:[#allocation7 + $0x11c] ss:$28 sps:$4 sm:$0xff]   ;;  %v1825_v36 = vld [vmem:[#allocation7 + $0x154] ss:$28 sps:$4 sm:$0xff]   ;;  %v1815_v37 = vld [vmem:[#allocation7 + $0xe8] ss:$28 sps:$4 sm:$0xff]  }
  0x76   : > { %v1824_v35 = vld [vmem:[#allocation7 + $0x118] ss:$28 sps:$4 sm:$0xff]   ;;  %v1823_v38 = vld [vmem:[#allocation7 + $0x124] ss:$28 sps:$4 sm:$0xff]   ;;  %v1830_v39 = vld [vmem:[#allocation7 + $0x150] ss:$28 sps:$4 sm:$0xff]  }
  0x77   : > { %v1831_v40 = vld [vmem:[#allocation7 + $0x18c] ss:$28 sps:$4 sm:$0xff]   ;;  %v1821_v41 = vld [vmem:[#allocation7 + $0x120] ss:$28 sps:$4 sm:$0xff]   ;;  %v1827_v45 = vld [vmem:[#allocation7 + $0x158] ss:$28 sps:$4 sm:$0xff]  }
  0x78   : > { %355 = vmatpush1.bf16.msra.mxu0 %v1788_v9  ;;  %1167 = vmatpush1.bf16.msra.mxu1 %v1806_v20  ;;  %v1829_v42 = vld [vmem:[#allocation7 + $0x15c] ss:$28 sps:$4 sm:$0xff]   ;;  %v1836_v43 = vld [vmem:[#allocation7 + $0x188] ss:$28 sps:$4 sm:$0xff]   ;;  %v1835_v46 = vld [vmem:[#allocation7 + $0x194] ss:$28 sps:$4 sm:$0xff]  }
  0x79   : > { %1215 = vmatprep.subr.bf16.mxu0 %v1793_v14  ;;  %1168 = vmatprep.subr.bf16.mxu1 %v1807_v21  ;;  %v1837_v44 = vld [vmem:[#allocation7 + $0x1c4] ss:$28 sps:$4 sm:$0xff]   ;;  %v1833_v48 = vld [vmem:[#allocation7 + $0x190] ss:$28 sps:$4 sm:$0xff]   ;;  %v1843_v49 = vld [vmem:[#allocation7 + $0x1fc] ss:$28 sps:$4 sm:$0xff]  }
  0x7a   : > { %v1842_v47 = vld [vmem:[#allocation7 + $0x1c0] ss:$28 sps:$4 sm:$0xff]   ;;  %v1841_v50 = vld [vmem:[#allocation7 + $0x1cc] ss:$28 sps:$4 sm:$0xff]   ;;  %v1848_v51 = vld [vmem:[#allocation7 + $0x1f8] ss:$28 sps:$4 sm:$0xff]  }
  0x7b   : > { %1553 = vmatmul.mubr.msk.bf16.vlgmr.msra.gmra.mrb[0].mxu0 %vm341_vm0, %v279_v17  ;;  %v1849_v52 = vld [vmem:[#allocation7 + $0x234] ss:$28 sps:$4 sm:$0xff]   ;;  %v1839_v53 = vld [vmem:[#allocation7 + $0x1c8] ss:$28 sps:$4 sm:$0xff]   ;;  %v1845_v57 = vld [vmem:[#allocation7 + $0x200] ss:$28 sps:$4 sm:$0xff]   ;;  %v291_v17 = vlaneseq }
  0x7c   : > { %390 = vmatprep.mubr.bf16.mxu0 %v2170_v0  ;;  %1216 = vmatpush1.bf16.msra.mxu0 %v1791_v18  ;;  %v1847_v54 = vld [vmem:[#allocation7 + $0x204] ss:$28 sps:$4 sm:$0xff]   ;;  %v1854_v55 = vld [vmem:[#allocation7 + $0x230] ss:$28 sps:$4 sm:$0xff]   ;;  %v1853_v58 = vld [vmem:[#allocation7 + $0x23c] ss:$28 sps:$4 sm:$0xff]  }
  0x7d   : > { %1217 = vmatprep.subr.bf16.mxu0 %v1799_v19  ;;  %1169 = vmatpush1.bf16.msra.mxu1 %v1812_v26  ;;  %v1855_v56 = vld [vmem:[#allocation7 + $0x26c] ss:$28 sps:$4 sm:$0xff]   ;;  %v1861_v60 = vld [vmem:[#allocation7 + $0x2a4] ss:$28 sps:$4 sm:$0xff]   ;;  %v1851_v61 = vld [vmem:[#allocation7 + $0x238] ss:$28 sps:$4 sm:$0xff]  }
  0x7e   : > { %1170 = vmatprep.subr.bf16.mxu1 %v1813_v27  ;;  %v1860_v59 = vld [vmem:[#allocation7 + $0x268] ss:$28 sps:$4 sm:$0xff]   ;;  %v1859_v62 = vld [vmem:[#allocation7 + $0x274] ss:$28 sps:$4 sm:$0xff]   ;;  %v1866_v63 = vld [vmem:[#allocation7 + $0x2a0] ss:$28 sps:$4 sm:$0xff]  }
  0x7f   : > { %v1857_v0 = vld [vmem:[#allocation7 + $0x270] ss:$28 sps:$4 sm:$0xff]   ;;  %v1863_v2 = vld [vmem:[#allocation7 + $0x2a8] ss:$28 sps:$4 sm:$0xff]   ;;  %v1867_v3 = vld [vmem:[#allocation7 + $0x2dc] ss:$28 sps:$4 sm:$0xff]  }
  0x80   : > { %1218 = vmatpush1.bf16.msra.mxu0 %v1797_v24  ;;  %v1865_v1 = vld [vmem:[#allocation7 + $0x2ac] ss:$28 sps:$4 sm:$0xff]   ;;  %v1871_v4 = vld [vmem:[#allocation7 + $0x2e4] ss:$28 sps:$4 sm:$0xff]   ;;  %v1872_v6 = vld [vmem:[#allocation7 + $0x2d8] ss:$28 sps:$4 sm:$0xff]  }
  0x81   : > { %1219 = vmatprep.subr.bf16.mxu0 %v1805_v25  ;;  %1171 = vmatpush1.bf16.msra.mxu1 %v1818_v31  ;;  %v1869_v5 = vld [vmem:[#allocation7 + $0x2e0] ss:$28 sps:$4 sm:$0xff]   ;;  %v1873_v7 = vld [vmem:[#allocation7 + $0x314] ss:$28 sps:$4 sm:$0xff]   ;;  %v1879_v11 = vld [vmem:[#allocation7 + $0x34c] ss:$28 sps:$4 sm:$0xff]  }
  0x82   : > { %1172 = vmatprep.subr.bf16.mxu1 %v1819_v32  ;;  %v1877_v8 = vld [vmem:[#allocation7 + $0x31c] ss:$28 sps:$4 sm:$0xff]   ;;  %v1878_v10 = vld [vmem:[#allocation7 + $0x310] ss:$28 sps:$4 sm:$0xff]   ;;  %v1884_v14 = vld [vmem:[#allocation7 + $0x348] ss:$28 sps:$4 sm:$0xff]  }
  0x83   : > { %1554 = vmatmul.mubr.msk.bf16.gmra.mrb[4].mxu0 %vm341_vm0, %v280_v28  ;;  %v1875_v9 = vld [vmem:[#allocation7 + $0x318] ss:$28 sps:$4 sm:$0xff]   ;;  %v1881_v13 = vld [vmem:[#allocation7 + $0x350] ss:$28 sps:$4 sm:$0xff]   ;;  %v2402_v18 = vshrl.u32 %v291_v17, 7  ;;  %s1427_s22 = scalar_lea.sflag [#allocation4], %s2382_s27 }
  0x84   : > { %1220 = vmatpush1.bf16.msra.mxu0 %v1803_v29  ;;  %v1883_v12 = vld [vmem:[#allocation7 + $0x354] ss:$28 sps:$4 sm:$0xff]   ;;  %v289_v20 = vld [vmem:[%s2536_s2] sm:$0x3]  ;;  %s2091_s9 = scalar_lea.vmem %s2488_s17, 3584  ;;  %p2553_p0 = scmp.ne.s32.totalorder %s2548_s8, 0 }
  0x85   : > { %1221 = vmatprep.subr.bf16.mxu0 %v1811_v30  ;;  %1173 = vmatpush1.bf16.msra.mxu1 %v1824_v35  ;;  %v1887_v15 = vld [vmem:[#allocation7 + $0x14] ss:$28 sps:$4 sm:$0xff]   ;;  %v293_v19 = vsub.s32 0, %v2402_v18  ;;  %v297_v21 = vsub.s32 1, %v2402_v18  ;;  %p2092_p11 = scmp.ne.s32.totalorder %s2488_s17, %s2091_s9  ;;  %s2171_s6 = smov [#allocation8]  }
  0x86   : > { %1174 = vmatprep.subr.bf16.mxu1 %v1825_v36  ;;  %v1888_v16 = vld [vmem:[#allocation7 + $0x1d8] ss:$28 sps:$4 sm:$0xff]   ;;  %v1914_v17 = vld [vmem:[#allocation7 + $0x130] ss:$28 sps:$4 sm:$0xff]   ;;  %s2095_s10 = sshll.u32 %s2171_s6, 4  ;;  %s2096_s10 = int_to_ptr.vmem [resolvable:$false] %s2095_s10 }
  0x87   : > { %v294_v22 = vrot.slane %v289_v20, %v293_v19  ;;  %v298_v23 = vrot.slane %v289_v20, %v297_v21  ;;  %v1917_v20 = vld [vmem:[#allocation7 + $0x164] ss:$28 sps:$4 sm:$0xff]   ;;  %p2093_p2 = pnand %p2092_p11, %p2553_p0  ;;  %s2097_s11 = scalar_lea.vmem %s2096_s10, 7168 }
  0x88   : > { %1222 = vmatpush1.bf16.msra.mxu0 %v1809_v33  ;;  %p2098_p5 = scmp.lt.s32.totalorder %s2488_s17, %s2096_s10  ;;  %p2099_p9 = scmp.lt.s32.totalorder %s2097_s11, %s2091_s9 }
  0x89   : > { %1223 = vmatprep.subr.bf16.mxu0 %v1817_v34  ;;  %1175 = vmatpush1.bf16.msra.mxu1 %v1830_v39  ;;  %p2094_p3 = pneg %p2093_p2 }
  0x8a   : > { %1176 = vmatprep.subr.bf16.mxu1 %v1831_v40  ;;  %p2100_p12 = por %p2099_p9, %p2098_p5 }
  0x8c   : > { %1224 = vmatpush1.bf16.msra.mxu0 %v1815_v37  ;;  %p2101_p1 = pnand %p2100_p12, %p2094_p3 }
  0x8d   : > { %1225 = vmatprep.subr.bf16.mxu0 %v1823_v38  ;;  %1177 = vmatpush1.bf16.msra.mxu1 %v1836_v43 }
  0x8e   : > { %1178 = vmatprep.subr.bf16.mxu1 %v1837_v44  ;;  %v1885_v44 = vld [vmem:[#allocation7 + $0x10] ss:$28 sps:$4 sm:$0xff]  }
  0x90   : > { %1226 = vmatpush1.bf16.msra.mxu0 %v1821_v41 }
  0x91   : > { %1227 = vmatprep.subr.bf16.mxu0 %v1829_v42  ;;  %1179 = vmatpush1.bf16.msra.mxu1 %v1842_v47 }
  0x92   : > { %1180 = vmatprep.subr.bf16.mxu1 %v1843_v49  ;;  %v1892_v49 = vld [vmem:[#allocation7 + $0x4c] ss:$28 sps:$4 sm:$0xff]  }
  0x94   : > { %1228 = vmatpush1.bf16.msra.mxu0 %v1827_v45 }
  0x95   : > { %1229 = vmatprep.subr.bf16.mxu0 %v1835_v46  ;;  %1181 = vmatpush1.bf16.msra.mxu1 %v1848_v51 }
  0x96   : > { %1182 = vmatprep.subr.bf16.mxu1 %v1849_v52 }
  0x98   : > { %1230 = vmatpush1.bf16.msra.mxu0 %v1833_v48  ;;  %v1889_v48 = vld [vmem:[#allocation7 + $0x18] ss:$28 sps:$4 sm:$0xff]  }
  0x99   : > { %1231 = vmatprep.subr.bf16.mxu0 %v1841_v50  ;;  %1183 = vmatpush1.bf16.msra.mxu1 %v1854_v55 }
  0x9a   : > { %1184 = vmatprep.subr.bf16.mxu1 %v1855_v56 }
  0x9c   : > { %1232 = vmatpush1.bf16.msra.mxu0 %v1839_v53  ;;  %v1893_v53 = vld [vmem:[#allocation7 + $0x210] ss:$28 sps:$4 sm:$0xff]  }
  0x9d   : > { %1233 = vmatprep.subr.bf16.mxu0 %v1847_v54  ;;  %1185 = vmatpush1.bf16.msra.mxu1 %v1860_v59 }
  0x9e   : > { %1186 = vmatprep.subr.bf16.mxu1 %v1861_v60  ;;  %v1890_v60 = vld [vmem:[#allocation7 + $0x48] ss:$28 sps:$4 sm:$0xff]  }
  0xa0   : > { %1234 = vmatpush1.bf16.msra.mxu0 %v1845_v57 }
  0xa1   : > { %1235 = vmatprep.subr.bf16.mxu0 %v1853_v58  ;;  %1187 = vmatpush1.bf16.msra.mxu1 %v1866_v63  ;;  %v1897_v63 = vld [vmem:[#allocation7 + $0x84] ss:$28 sps:$4 sm:$0xff]  }
  0xa2   : > { %1188 = vmatprep.subr.bf16.mxu1 %v1867_v3 }
  0xa4   : > { %1236 = vmatpush1.bf16.msra.mxu0 %v1851_v61  ;;  %v1894_v61 = vld [vmem:[#allocation7 + $0x50] ss:$28 sps:$4 sm:$0xff]  }
  0xa5   : > { %1237 = vmatprep.subr.bf16.mxu0 %v1859_v62  ;;  %1189 = vmatpush1.bf16.msra.mxu1 %v1872_v6  ;;  %v1902_v6 = vld [vmem:[#allocation7 + $0xbc] ss:$28 sps:$4 sm:$0xff]  }
  0xa6   : > { %1190 = vmatprep.subr.bf16.mxu1 %v1873_v7  ;;  %v1903_v7 = vld [vmem:[#allocation7 + $0x280] ss:$28 sps:$4 sm:$0xff]  }
  0xa8   : > { %1238 = vmatpush1.bf16.msra.mxu0 %v1857_v0  ;;  %v1898_v0 = vld [vmem:[#allocation7 + $0x248] ss:$28 sps:$4 sm:$0xff]  }
  0xa9   : > { %1239 = vmatprep.subr.bf16.mxu0 %v1865_v1  ;;  %1191 = vmatpush1.bf16.msra.mxu1 %v1878_v10  ;;  %v1907_v10 = vld [vmem:[#allocation7 + $0xf4] ss:$28 sps:$4 sm:$0xff]  }
  0xaa   : > { %1192 = vmatprep.subr.bf16.mxu1 %v1879_v11  ;;  %v1908_v11 = vld [vmem:[#allocation7 + $0x2b8] ss:$28 sps:$4 sm:$0xff]  }
  0xac   : > { %1240 = vmatpush1.bf16.msra.mxu0 %v1863_v2 }
  0xad   : > { %1241 = vmatprep.subr.bf16.mxu0 %v1871_v4  ;;  %1193 = vmatpush1.bf16.msra.mxu1 %v1884_v14  ;;  %v1895_v4 = vld [vmem:[#allocation7 + $0x80] ss:$28 sps:$4 sm:$0xff]   ;;  %v1912_v14 = vld [vmem:[#allocation7 + $0x12c] ss:$28 sps:$4 sm:$0xff]  }
  0xae   : > { %1268 = vmatprep.subr.bf16.mxu1 %v1887_v15  ;;  %v1913_v15 = vld [vmem:[#allocation7 + $0x2f0] ss:$28 sps:$4 sm:$0xff]  }
  0xb0   : > { %1242 = vmatpush1.bf16.msra.mxu0 %v1869_v5  ;;  %v1899_v5 = vld [vmem:[#allocation7 + $0x88] ss:$28 sps:$4 sm:$0xff]  }
  0xb1   : > { %1243 = vmatprep.subr.bf16.mxu0 %v1877_v8  ;;  %v1900_v8 = vld [vmem:[#allocation7 + $0xb8] ss:$28 sps:$4 sm:$0xff]  }
  0xb4   : > { %1244 = vmatpush1.bf16.msra.mxu0 %v1875_v9  ;;  %v1904_v9 = vld [vmem:[#allocation7 + $0xc0] ss:$28 sps:$4 sm:$0xff]  }
  0xb5   : > { %1245 = vmatprep.subr.bf16.mxu0 %v1883_v12  ;;  %v1905_v12 = vld [vmem:[#allocation7 + $0xf0] ss:$28 sps:$4 sm:$0xff]  }
  0xb8   : > { %1246 = vmatpush1.bf16.msra.mxu0 %v1881_v13  ;;  %v1909_v13 = vld [vmem:[#allocation7 + $0xf8] ss:$28 sps:$4 sm:$0xff]  }
  0xb9   : > { %1673 = vmatprep.subr.bf16.mxu0 %v1888_v16  ;;  %v1910_v16 = vld [vmem:[#allocation7 + $0x128] ss:$28 sps:$4 sm:$0xff]  }
 0x14e   : > { %v382_v24 = vpop.f32.mrb[0].mxu0 }
 0x14f   : > { %v383_v25 = vadd.f32 %v382_v24, %v294_v22  ;;  %v384_v26 = vpop.f32.mrb[1].mxu0  ;;  %v1919_v24 = vld [vmem:[#allocation7 + $0x168] ss:$28 sps:$4 sm:$0xff]  }
 0x150   : > { %v385_v27 = vadd.f32 %v384_v26, %v298_v23  ;;  %v386_v28 = vpop.f32.mrb[2].mxu0  ;;  %v1923_v26 = vld [vmem:[#allocation7 + $0x360] ss:$28 sps:$4 sm:$0xff]  }
 0x151   : > { %v401_v29 = vmul.f32 0.01, %v383_v25  ;;  %v387_v30 = vadd.f32 %v386_v28, %v294_v22  ;;  %v388_v31 = vpop.f32.mrb[3].mxu0  ;;  %v1924_v28 = vld [vmem:[#allocation7 + $0x1a0] ss:$28 sps:$4 sm:$0xff]  }
 0x152   : > { %v402_v32 = vmul.f32 0.01, %v385_v27  ;;  %v389_v33 = vadd.f32 %v388_v31, %v298_v23  ;;  %v1930_v31 = vld [vmem:[#allocation7 + $0x20c] ss:$28 sps:$4 sm:$0xff]  }
 0x153   : > { %v403_v34 = vmul.f32 0.01, %v387_v30  ;;  %v409_v36 = vmax.f32 %v383_v25, %v401_v29  ;;  %v1922_v25 = vld [vmem:[#allocation7 + $0x19c] ss:$28 sps:$4 sm:$0xff]   ;;  %v1927_v29 = vld [vmem:[#allocation7 + $0x1d4] ss:$28 sps:$4 sm:$0xff]  }
 0x154   : > { %v404_v35 = vmul.f32 0.01, %v389_v33  ;;  %v410_v38 = vmax.f32 %v385_v27, %v402_v32  ;;  %v1920_v27 = vld [vmem:[#allocation7 + $0x198] ss:$28 sps:$4 sm:$0xff]   ;;  %v1928_v32 = vld [vmem:[#allocation7 + $0x208] ss:$28 sps:$4 sm:$0xff]  }
 0x155   : > { %v411_v37 = vmax.f32 %v387_v30, %v403_v34  ;;  %v1925_v30 = vld [vmem:[#allocation7 + $0x1d0] ss:$28 sps:$4 sm:$0xff]   ;;  %v1931_v34 = vld [vmem:[#allocation7 + $0x240] ss:$28 sps:$4 sm:$0xff]  }
 0x156   : > { %v412_v39 = vmax.f32 %v389_v33, %v404_v35  ;;  %v392_v40 = vpop.f32.mrb[4].mxu0  ;;  %v1933_v33 = vld [vmem:[#allocation7 + $0x244] ss:$28 sps:$4 sm:$0xff]   ;;  %v1936_v35 = vld [vmem:[#allocation7 + $0x27c] ss:$28 sps:$4 sm:$0xff]  }
 0x157   : > { %v2413_v41 = vpack.c.bf16 %v411_v37, %v409_v36  ;;  %v393_v42 = vadd.f32 %v392_v40, %v294_v22  ;;  %v394_v43 = vpop.f32.mrb[5].mxu0  ;;  %v1934_v36 = vld [vmem:[#allocation7 + $0x278] ss:$28 sps:$4 sm:$0xff]   ;;  %v1940_v40 = vld [vmem:[#allocation7 + $0x2e8] ss:$28 sps:$4 sm:$0xff]  }
 0x158   : > { %v418_v45 = vpack.c.bf16 %v412_v39, %v410_v38  ;;  %v395_v46 = vadd.f32 %v394_v43, %v298_v23  ;;  %v396_v47 = vpop.f32.mrb[6].mxu0  ;;  %v1939_v37 = vld [vmem:[#allocation7 + $0x2b4] ss:$28 sps:$4 sm:$0xff]   ;;  %v1942_v39 = vld [vmem:[#allocation7 + $0x2ec] ss:$28 sps:$4 sm:$0xff]  }
 0x159   : > { %v405_v50 = vmul.f32 0.01, %v393_v42  ;;  %v397_v51 = vadd.f32 %v396_v47, %v294_v22  ;;  %v398_v52 = vpop.f32.mrb[7].mxu0  ;;  %v1918_v22 = vld [vmem:[#allocation7 + $0x328] ss:$28 sps:$4 sm:$0xff]  }
 0x15a   : > { %v406_v54 = vmul.f32 0.01, %v395_v46  ;;  %v399_v55 = vadd.f32 %v398_v52, %v298_v23  ;;  %1194 = vmatprep.mubr.bf16.mxu1 %v418_v45  ;;  %1247 = vmatprep.mubr.bf16.mxu0 %v418_v45  ;;  %v1915_v23 = vld [vmem:[#allocation7 + $0x160] ss:$28 sps:$4 sm:$0xff]   ;;  %v1937_v38 = vld [vmem:[#allocation7 + $0x2b0] ss:$28 sps:$4 sm:$0xff]  }
 0x15b   : > { %v413_v56 = vmax.f32 %v393_v42, %v405_v50  ;;  %v407_v57 = vmul.f32 0.01, %v397_v51  ;;  %1195 = vmatmul.mubr.bf16.vlgmr.msra.gmra.mrb[0].mxu1 %v2413_v41  ;;  %1248 = vmatmul.mubr.bf16.vlgmr.msra.gmra.mrb[8].mxu0 %v2413_v41  ;;  %v1945_v42 = vld [vmem:[#allocation7 + $0x324] ss:$28 sps:$4 sm:$0xff]  }
 0x15c   : > { %v414_v58 = vmax.f32 %v395_v46, %v406_v54  ;;  %v408_v59 = vmul.f32 0.01, %v399_v55  ;;  %1269 = vmatpush1.bf16.msra.mxu1 %v1885_v44  ;;  %1674 = vmatpush3.bf16.msra.mxu0 %v1889_v48  ;;  %v1943_v43 = vld [vmem:[#allocation7 + $0x320] ss:$28 sps:$4 sm:$0xff]   ;;  %v561_v46 = vsub.s32 2, %v2402_v18  ;;  %v565_v48 = vsub.s32 3, %v2402_v18 }
 0x15d   : > { %v415_v62 = vmax.f32 %v397_v51, %v407_v57  ;;  %1270 = vmatprep.subr.bf16.mxu1 %v1892_v49  ;;  %1675 = vmatprep.subr.bf16.mxu0 %v1893_v53  ;;  %v1948_v44 = vld [vmem:[#allocation7 + $0x35c] ss:$28 sps:$4 sm:$0xff]   ;;  %v2435_v47 = vld [vmem:[%s2538_s4] sm:$0xff] }
 0x15e   : > { %v416_v1 = vmax.f32 %v399_v55, %v408_v59  ;;  %v554_v49 = vrot.slane %v2435_v47, %v293_v19  ;;  %v562_v50 = vrot.slane %v2435_v47, %v561_v46  ;;  %v566_v51 = vrot.slane %v2435_v47, %v565_v48 }
 0x15f   : > { %v2417_v2 = vpack.c.bf16 %v415_v62, %v413_v56 }
 0x160   : > { %v2419_v3 = vpack.c.bf16 %v416_v1, %v414_v58  ;;  %1271 = vmatpush1.bf16.msra.mxu1 %v1890_v60  ;;  %1676 = vmatpush3.bf16.msra.mxu0 %v1894_v61 }
 0x161   : > { %1272 = vmatprep.subr.bf16.mxu1 %v1897_v63  ;;  %1677 = vmatprep.subr.bf16.mxu0 %v1898_v0 }
 0x162   : > { %1204 = vmatprep.mubr.bf16.mxu1 %v2419_v3  ;;  %1257 = vmatprep.mubr.bf16.mxu0 %v2419_v3 }
 0x163   : > { %1205 = vmatmul.mubr.bf16.gmra.mrb[4].mxu1 %v2417_v2  ;;  %1258 = vmatmul.mubr.bf16.gmra.mrb[12].mxu0 %v2417_v2 }
 0x164   : > { %1273 = vmatpush1.bf16.msra.mxu1 %v1895_v4  ;;  %1678 = vmatpush3.bf16.msra.mxu0 %v1899_v5 }
 0x165   : > { %1300 = vmatprep.mubr.bf16.mxu1 %v418_v45  ;;  %1353 = vmatprep.mubr.bf16.mxu0 %v418_v45  ;;  %v1946_v45 = vld [vmem:[#allocation7 + $0x358] ss:$28 sps:$4 sm:$0xff]  }
 0x166   : > { %1274 = vmatprep.subr.bf16.mxu1 %v1902_v6  ;;  %1679 = vmatprep.subr.bf16.mxu0 %v1903_v7 }
 0x168   : > { %1275 = vmatpush1.bf16.msra.mxu1 %v1900_v8  ;;  %1680 = vmatpush3.bf16.msra.mxu0 %v1904_v9 }
 0x169   : > { %1276 = vmatprep.subr.bf16.mxu1 %v1907_v10  ;;  %1681 = vmatprep.subr.bf16.mxu0 %v1908_v11 }
 0x16c   : > { %1277 = vmatpush1.bf16.msra.mxu1 %v1905_v12  ;;  %1682 = vmatpush3.bf16.msra.mxu0 %v1909_v13 }
 0x16d   : > { %1278 = vmatprep.subr.bf16.mxu1 %v1912_v14  ;;  %1683 = vmatprep.subr.bf16.mxu0 %v1913_v15 }
 0x170   : > { %1279 = vmatpush1.bf16.msra.mxu1 %v1910_v16  ;;  %1684 = vmatpush3.bf16.msra.mxu0 %v1914_v17 }
 0x171   : > { %1280 = vmatprep.subr.bf16.mxu1 %v1917_v20  ;;  %1685 = vmatprep.subr.bf16.mxu0 %v1918_v22 }
 0x174   : > { %1281 = vmatpush1.bf16.msra.mxu1 %v1915_v23  ;;  %1686 = vmatpush3.bf16.msra.mxu0 %v1919_v24 }
 0x175   : > { %1282 = vmatprep.subr.bf16.mxu1 %v1922_v25  ;;  %1687 = vmatprep.subr.bf16.mxu0 %v1923_v26 }
 0x178   : > { %1283 = vmatpush1.bf16.msra.mxu1 %v1920_v27  ;;  %1688 = vmatpush3.bf16.msra.mxu0 %v1924_v28 }
 0x179   : > { %1284 = vmatprep.subr.bf16.mxu1 %v1927_v29 }
 0x17b   : > { %1354 = vmatmul.mubr.bf16.vlgmr.msra.gmra.mrb[16].mxu0 %v2413_v41 }
 0x17c   : > { %1285 = vmatpush1.bf16.msra.mxu1 %v1925_v30  ;;  %1361 = vmatprep.mubr.bf16.mxu0 %v2419_v3 }
 0x17d   : > { %1286 = vmatprep.subr.bf16.mxu1 %v1930_v31 }
 0x180   : > { %1287 = vmatpush1.bf16.msra.mxu1 %v1928_v32 }
 0x181   : > { %1288 = vmatprep.subr.bf16.mxu1 %v1933_v33 }
 0x183   : > { %1362 = vmatmul.mubr.bf16.gmra.mrb[20].mxu0 %v2417_v2 }
 0x184   : > { %1289 = vmatpush1.bf16.msra.mxu1 %v1931_v34 }
 0x185   : > { %1290 = vmatprep.subr.bf16.mxu1 %v1936_v35 }
 0x188   : > { %1291 = vmatpush1.bf16.msra.mxu1 %v1934_v36 }
 0x189   : > { %1292 = vmatprep.subr.bf16.mxu1 %v1939_v37  ;;  %v577_v37 = vsub.s32 6, %v2402_v18 }
 0x18c   : > { %1293 = vmatpush1.bf16.msra.mxu1 %v1937_v38 }
 0x18d   : > { %1294 = vmatprep.subr.bf16.mxu1 %v1942_v39  ;;  %v578_v39 = vrot.slane %v2435_v47, %v577_v37 }
 0x190   : > { %1295 = vmatpush1.bf16.msra.mxu1 %v1940_v40 }
 0x191   : > { %1296 = vmatprep.subr.bf16.mxu1 %v1945_v42 }
 0x194   : > { %1297 = vmatpush1.bf16.msra.mxu1 %v1943_v43 }
 0x195   : > { %1298 = vmatprep.subr.bf16.mxu1 %v1948_v44 }
 0x198   : > { %1299 = vmatpush1.bf16.msra.mxu1 %v1946_v45 }
 0x19b   : > { %1301 = vmatmul.mubr.bf16.vlgmr.msra.gmra.mrb[8].mxu1 %v2413_v41  ;;  %v558_v41 = vrot.slane %v2435_v47, %v297_v21 }
 0x19c   : > { %1310 = vmatprep.mubr.bf16.mxu1 %v2419_v3 }
 0x1a3   : > { %1311 = vmatmul.mubr.bf16.gmra.mrb[12].mxu1 %v2417_v2 }
 0x22e   : > { %v1196_v52 = vpop.f32.mrb[0].mxu1  ;;  %v1249_v53 = vpop.f32.mrb[8].mxu0 }
 0x22f   : > { %v1197_v54 = vadd.f32 %v1196_v52, %v554_v49  ;;  %v1250_v55 = vadd.f32 %v1249_v53, %v562_v50  ;;  %v1198_v56 = vpop.f32.mrb[1].mxu1  ;;  %v1251_v57 = vpop.f32.mrb[9].mxu0 }
 0x230   : > { %v1199_v58 = vadd.f32 %v1198_v56, %v558_v41  ;;  %v1252_v59 = vadd.f32 %v1251_v57, %v566_v51  ;;  %v1200_v60 = vpop.f32.mrb[2].mxu1  ;;  %v1253_v61 = vpop.f32.mrb[10].mxu0 }
 0x231   : > { %1949 = vtanh.f32 %v1197_v54  ;;  %v1201_v19 = vadd.f32 %v1200_v60, %v554_v49  ;;  %v1202_v62 = vpop.f32.mrb[3].mxu1  ;;  %v1255_v63 = vpop.f32.mrb[11].mxu0  ;;  %v1254_v0 = vadd.f32 %v1253_v61, %v562_v50  ;;  %v573_v61 = vsub.s32 5, %v2402_v18 }
 0x232   : > { %1951 = vtanh.f32 %v1250_v55  ;;  %v1203_v21 = vadd.f32 %v1202_v62, %v558_v41  ;;  %v1256_v1 = vadd.f32 %v1255_v63, %v566_v51 }
 0x233   : > { %1953 = vtanh.f32 %v1199_v58  ;;  %v574_v62 = vrot.slane %v2435_v47, %v573_v61 }
 0x234   : > { %1955 = vtanh.f32 %v1252_v59  ;;  %v569_v59 = vsub.s32 4, %v2402_v18 }
 0x235   : > { %1957 = vtanh.f32 %v1201_v19 }
 0x236   : > { %1959 = vtanh.f32 %v1254_v0  ;;  %v1259_v2 = vpop.f32.mrb[12].mxu0  ;;  %v1206_v3 = vpop.f32.mrb[4].mxu1  ;;  %v570_v19 = vrot.slane %v2435_v47, %v569_v59 }
 0x237   : > { %1961 = vtanh.f32 %v1203_v21  ;;  %v1260_v4 = vadd.f32 %v1259_v2, %v562_v50  ;;  %v1261_v5 = vpop.f32.mrb[13].mxu0  ;;  %v1208_v6 = vpop.f32.mrb[5].mxu1  ;;  %v1207_v12 = vadd.f32 %v1206_v3, %v554_v49 }
 0x238   : > { %1963 = vtanh.f32 %v1256_v1  ;;  %v1262_v7 = vadd.f32 %v1261_v5, %v566_v51  ;;  %v1263_v8 = vpop.f32.mrb[14].mxu0  ;;  %v1210_v9 = vpop.f32.mrb[6].mxu1  ;;  %v1209_v15 = vadd.f32 %v1208_v6, %v558_v41 }
 0x239   : > { %1965 = vtanh.f32 %v1260_v4  ;;  %v1264_v10 = vadd.f32 %v1263_v8, %v562_v50  ;;  %v1265_v11 = vpop.f32.mrb[15].mxu0  ;;  %v1212_v13 = vpop.f32.mrb[7].mxu1  ;;  %v1211_v17 = vadd.f32 %v1210_v9, %v554_v49 }
 0x23a   : > { %1967 = vtanh.f32 %v1262_v7  ;;  %v1266_v14 = vadd.f32 %v1265_v11, %v566_v51  ;;  %v1213_v22 = vadd.f32 %v1212_v13, %v558_v41 }
 0x23b   : > { %v1950_v16 = vpop.eup %1949  ;;  %1969 = vtanh.f32 %v1264_v10 }
 0x23c   : > { %v1952_v20 = vpop.eup %1951  ;;  %1398 = vst [vmem:[%s2447_s13] sm:$0xff] %v1950_v16  ;;  %1971 = vtanh.f32 %v1266_v14 }
 0x23d   : > { %v1954_v23 = vpop.eup %1953  ;;  %1400 = vst [vmem:[%s2447_s13 + $0x10] sm:$0xff] %v1952_v20  ;;  %1973 = vtanh.f32 %v1207_v12 }
 0x23e   : > { %v1956_v24 = vpop.eup %1955  ;;  %1399 = vst [vmem:[%s2447_s13 + $0x8] sm:$0xff] %v1954_v23  ;;  %1975 = vtanh.f32 %v1209_v15 }
 0x23f   : > { %v1958_v25 = vpop.eup %1957  ;;  %1401 = vst [vmem:[%s2447_s13 + $0x18] sm:$0xff] %v1956_v24  ;;  %1977 = vtanh.f32 %v1211_v17 }
 0x240   : > { %v1960_v26 = vpop.eup %1959  ;;  %1405 = vst [vmem:[%s2447_s13 + $0x38] sm:$0xff] %v1958_v25  ;;  %1979 = vtanh.f32 %v1213_v22 }
 0x241   : > { %v1962_v27 = vpop.eup %1961  ;;  %1407 = vst [vmem:[%s2447_s13 + $0x48] sm:$0xff] %v1960_v26 }
 0x242   : > { %v1964_v28 = vpop.eup %1963  ;;  %1406 = vst [vmem:[%s2447_s13 + $0x40] sm:$0xff] %v1962_v27 }
 0x243   : > { %v1966_v29 = vpop.eup %1965  ;;  %1408 = vst [vmem:[%s2447_s13 + $0x50] sm:$0xff] %v1964_v28 }
 0x244   : > { %v1968_v30 = vpop.eup %1967  ;;  %1414 = vst [vmem:[%s2447_s13 + $0x80] sm:$0xff] %v1966_v29 }
 0x245   : > { %v1970_v31 = vpop.eup %1969  ;;  %1415 = vst [vmem:[%s2447_s13 + $0x88] sm:$0xff] %v1968_v30 }
 0x246   : > { %v1972_v32 = vpop.eup %1971  ;;  %1421 = vst [vmem:[%s2447_s13 + $0xb8] sm:$0xff] %v1970_v31 }
 0x247   : > { %v1974_v33 = vpop.eup %1973  ;;  %1422 = vst [vmem:[%s2447_s13 + $0xc0] sm:$0xff] %v1972_v32 }
 0x248   : > { %v1976_v34 = vpop.eup %1975  ;;  %1412 = vst [vmem:[%s2447_s13 + $0x70] sm:$0xff] %v1974_v33 }
 0x249   : > { %v1978_v35 = vpop.eup %1977  ;;  %1413 = vst [vmem:[%s2447_s13 + $0x78] sm:$0xff] %v1976_v34 }
 0x24a   : > { %v1980_v36 = vpop.eup %1979  ;;  %1419 = vst [vmem:[%s2447_s13 + $0xa8] sm:$0xff] %v1978_v35 }
 0x24b   : > { %1420 = vst [vmem:[%s2447_s13 + $0xb0] sm:$0xff] %v1980_v36 }
 0x24e   : > { %v1689_v38 = vpop.f32.mrb[16].mxu0 }
 0x24f   : > { %v1690_v40 = vpop.f32.mrb[17].mxu0 }
 0x250   : > { %v1691_v42 = vadd.f32 %v1690_v40, %v1689_v38  ;;  %v1692_v43 = vpop.f32.mrb[18].mxu0 }
 0x251   : > { %v1693_v44 = vpop.f32.mrb[19].mxu0 }
 0x252   : > { %v1356_v45 = vadd.f32 %v1691_v42, %v578_v39  ;;  %v1694_v46 = vadd.f32 %v1693_v44, %v1692_v43 }
 0x254   : > { %1981 = vtanh.f32 %v1356_v45  ;;  %v1359_v48 = vadd.f32 %v1694_v46, %v578_v39 }
 0x256   : > { %1983 = vtanh.f32 %v1359_v48  ;;  %v1695_v49 = vpop.f32.mrb[20].mxu0 }
 0x257   : > { %v1696_v50 = vpop.f32.mrb[21].mxu0 }
 0x258   : > { %v1697_v41 = vadd.f32 %v1696_v50, %v1695_v49  ;;  %v1698_v51 = vpop.f32.mrb[22].mxu0 }
 0x259   : > { %v1699_v52 = vpop.f32.mrb[23].mxu0 }
 0x25a   : > { %v1364_v53 = vadd.f32 %v1697_v41, %v578_v39  ;;  %v1700_v54 = vadd.f32 %v1699_v52, %v1698_v51 }
 0x25c   : > { %1985 = vtanh.f32 %v1364_v53  ;;  %v1367_v55 = vadd.f32 %v1700_v54, %v578_v39 }
 0x25e   : > { %v1982_v56 = vpop.eup %1981  ;;  %1987 = vtanh.f32 %v1367_v55 }
 0x25f   : > { %1404 = vst [vmem:[%s2447_s13 + $0x30] sm:$0xff] %v1982_v56 }
 0x260   : > { %v1984_v57 = vpop.eup %1983 }
 0x261   : > { %1411 = vst [vmem:[%s2447_s13 + $0x68] sm:$0xff] %v1984_v57 }
 0x266   : > { %v1986_v58 = vpop.eup %1985 }
 0x267   : > { %1418 = vst [vmem:[%s2447_s13 + $0xa0] sm:$0xff] %v1986_v58 }
 0x268   : > { %v1988_v60 = vpop.eup %1987 }
 0x269   : > { %1425 = vst [vmem:[%s2447_s13 + $0xd8] sm:$0xff] %v1988_v60 }
 0x26e   : > { %v1302_v63 = vpop.f32.mrb[8].mxu1 }
 0x26f   : > { %v1303_v0 = vadd.f32 %v1302_v63, %v570_v19  ;;  %v1304_v21 = vpop.f32.mrb[9].mxu1 }
 0x270   : > { %v1305_v1 = vadd.f32 %v1304_v21, %v574_v62  ;;  %v1306_v2 = vpop.f32.mrb[10].mxu1 }
 0x271   : > { %1989 = vtanh.f32 %v1303_v0  ;;  %v1307_v3 = vadd.f32 %v1306_v2, %v570_v19  ;;  %v1308_v4 = vpop.f32.mrb[11].mxu1 }
 0x272   : > { %1991 = vtanh.f32 %v1305_v1  ;;  %v1309_v5 = vadd.f32 %v1308_v4, %v574_v62 }
 0x273   : > { %1993 = vtanh.f32 %v1307_v3 }
 0x274   : > { %1995 = vtanh.f32 %v1309_v5 }
 0x276   : > { %v1312_v6 = vpop.f32.mrb[12].mxu1 }
 0x277   : > { %v1313_v18 = vadd.f32 %v1312_v6, %v570_v19  ;;  %v1314_v7 = vpop.f32.mrb[13].mxu1 }
 0x278   : > { %v1315_v8 = vadd.f32 %v1314_v7, %v574_v62  ;;  %v1316_v47 = vpop.f32.mrb[14].mxu1 }
 0x279   : > { %1997 = vtanh.f32 %v1313_v18  ;;  %v1317_v9 = vadd.f32 %v1316_v47, %v570_v19  ;;  %v1318_v10 = vpop.f32.mrb[15].mxu1 }
 0x27a   : > { %1999 = vtanh.f32 %v1315_v8  ;;  %v1319_v11 = vadd.f32 %v1318_v10, %v574_v62 }
 0x27b   : > { %v1990_v12 = vpop.eup %1989  ;;  %2001 = vtanh.f32 %v1317_v9 }
 0x27c   : > { %v1992_v13 = vpop.eup %1991  ;;  %1402 = vst [vmem:[%s2447_s13 + $0x20] sm:$0xff] %v1990_v12  ;;  %2003 = vtanh.f32 %v1319_v11 }
 0x27d   : > { %v1994_v14 = vpop.eup %1993  ;;  %1403 = vst [vmem:[%s2447_s13 + $0x28] sm:$0xff] %v1992_v13 }
 0x27e   : > { %v1996_v15 = vpop.eup %1995  ;;  %1409 = vst [vmem:[%s2447_s13 + $0x58] sm:$0xff] %v1994_v14 }
 0x27f   : > { %1410 = vst [vmem:[%s2447_s13 + $0x60] sm:$0xff] %v1996_v15 }
 0x283   : > { %v1998_v16 = vpop.eup %1997 }
 0x284   : > { %v2000_v17 = vpop.eup %1999  ;;  %1416 = vst [vmem:[%s2447_s13 + $0x90] sm:$0xff] %v1998_v16 }
 0x285   : > { %v2002_v20 = vpop.eup %2001  ;;  %1417 = vst [vmem:[%s2447_s13 + $0x98] sm:$0xff] %v2000_v17 }
 0x286   : > { %v2004_v22 = vpop.eup %2003  ;;  %1423 = vst [vmem:[%s2447_s13 + $0xc8] sm:$0xff] %v2002_v20 }
 0x287   : > { %1424 = vst [vmem:[%s2447_s13 + $0xd0] sm:$0xff] %v2004_v22 }
 0x288   : > { %2104 = shalt.err (!%p2101_p1)
}
 0x289   : > { %s2105_s24 = scalar_lea.hbm %s2485_s30, 3584  ;;  %s2109_s16 = scalar_lea.hbm %s2539_s5, 7168 }
 0x28a   : > { %p2106_p13 = scmp.ne.s32.totalorder %s2485_s30, %s2105_s24  ;;  %p2110_p4 = scmp.lt.u32.totalorder %s2485_s30, %s2539_s5 }
 0x28b   : > { %p2111_p7 = scmp.lt.u32.totalorder %s2109_s16, %s2105_s24  ;;  %p2113_p11 = scmp.lt.u32.totalorder %s2105_s24, %s2485_s30 }
 0x28c   : > { %p2107_p6 = pnand %p2106_p13, %p2553_p0 }
 0x28d   : > { %p2112_p8 = por %p2111_p7, %p2110_p4 }
 0x28e   : > { %p2108_p10 = pneg %p2107_p6 }
 0x28f   : > { %p2114_p2 = por %p2113_p11, %p2112_p8 }
 0x291   : > { %p2115_p3 = pnand %p2114_p2, %p2108_p10 }
 0x293   : > { %2118 = shalt.err (!%p2115_p3)
}
 0x294   : > { %s2172_s14 = smov 896   ;;  %s2173_s29 = smov 56  }
 0x295   : > { %1713 = dma.vmem_to_hbm [thread:$0]  (%p2553_p0), %s2488_s17, 3584, %s2485_s30, %s1427_s22, %s2172_s14, %s2172_s14, %s2173_s29  }
 0x296 PF: > { %s1456_s12 = sand.u32 1, %s2149_s18   ;;  %p2554_p5 = scmp.ne.s32.totalorder %s2544_s25, 0 }
 0x297   : > { %p2555_p9 = scmp.ge.s32.totalorder %s2161_s21, 2  ;;  %s1457_s9 = scalar_lea.sflag [#allocation4], %s1456_s12 }
 0x299   : > { %p1727_p12 = pnand %p2555_p9, %p2554_p5 }
 0x29b   : > { %2144 = dma.done.wait (!%p1727_p12), %s1457_s9, 3584  }
 0x29c   : > { %2146 = vsyncadd (!%p1727_p12), %s1457_s9, 4294963712  ;;  %p19_p1 = scmp.ge.s32.totalorder %s2317_s23, 4   ;;  %s2556_s18 = smov %s2153_s19 }
 0x29d   : > { %s2557_s19 = smov %s2157_s20  ;;  %s2558_s20 = smov %s2326_s7 }
 0x29e   : > { %s2559_s21 = smov %s2317_s23  ;;  %21 = sbr.rel (!%p19_p1) target bundleno = 6 (0x6), region = 93 }
 0x2a5   :  { %1462 = vsyncpa [#allocation3], 1 }
 0x2a6   :  { %1464 = vsyncpa [#allocation3 + $0x1], 1 }
 0x2a7   :  { %1465 = vsyncpa [#allocation6], 1 }
 0x2a8   :  { %1466 = vsyncpa [#allocation4], 1 }
 0x2a9   :  { %1468 = vsyncpa [#allocation4 + $0x1], 1 }

</bundles_post_ra>
